<compile_context>
chip_gen: v7x
topology: tpu7x:2x2x1
jax: 0.10.0
libtpu: 0.0.40
codegen_flags: <defaults>
</compile_context>

<pallas_src>
import functools
import math

import jax
import jax.numpy as jnp
from jax import lax
from jax.experimental import pallas as pl
from jax.experimental.pallas import tpu as pltpu


def make_pe_table(embed_dim: int, max_len: int) -> jnp.ndarray:
    """Deterministic sinusoidal table, identical to the PyTorch __init__."""
    position = jnp.arange(max_len, dtype=jnp.float32)[:, None]            # [max_len, 1]
    div_term = jnp.exp(
        jnp.arange(0, embed_dim, 2, dtype=jnp.float32)
        * (-math.log(10000.0) / embed_dim)
    )                                                                     # [D/2]
    pe = jnp.zeros((max_len, embed_dim), dtype=jnp.float32)
    pe = pe.at[:, 0::2].set(jnp.sin(position * div_term))
    pe = pe.at[:, 1::2].set(jnp.cos(position * div_term))
    return pe


def _pe_add_kernel(pos_ref, hidden_ref, pe_ref, out_ref, *, max_len: int):
    # [Rt, 1] int32 positions; clamp so padded tail rows / bad inputs never
    # read the PE table out of bounds (OOB VMEM reads are unchecked on TPU).
    pos = jnp.clip(pos_ref[...], 0, max_len - 1)                          # [Rt, 1]
    rt = pos_ref.shape[0]

    # Vectorized gather: one-hot built on the VPU, contracted on the MXU.
    lane_ids = lax.broadcasted_iota(jnp.int32, (rt, max_len), 1)          # [Rt, max_len]
    one_hot = (lane_ids == pos).astype(jnp.float32)                       # [Rt, max_len]
    gathered = jnp.dot(one_hot, pe_ref[...],
                       precision=lax.Precision.HIGHEST,
                       preferred_element_type=jnp.float32)                # [Rt, D]

    # Single full-tile add + store; compute in f32, cast to output dtype.
    out_ref[...] = (hidden_ref[...].astype(jnp.float32) + gathered).astype(out_ref.dtype)
    # TODO(synk): dropout is identity (eval mode); a training-mode dropout
    # would use pltpu.prng_seed / pltpu.prng_random_bits here.


def positional_encoding(hidden: jnp.ndarray,
                        seq_pos: jnp.ndarray,
                        pe: jnp.ndarray,
                        *,
                        row_block: int = 1024) -> jnp.ndarray:
    """hidden: [B, S, D]; seq_pos: [B, S] int; pe: [max_len, D] f32."""
    B, S, D = hidden.shape
    max_len, d_pe = pe.shape
    assert d_pe == D, "PE table embed dim mismatch"

    R = B * S
    hidden2 = hidden.reshape(R, D)
    pos2 = seq_pos.reshape(R, 1).astype(jnp.int32)

    # Row block: as large as practical; must be a multiple of 8 sublanes
    # unless it spans the whole row axis.
    rt = min(row_block, R)
    if rt != R:
        rt = max(8, (rt // 8) * 8)
    grid = (pl.cdiv(R, rt),)

    kernel = functools.partial(_pe_add_kernel, max_len=max_len)

    itemsize = jnp.dtype(hidden.dtype).itemsize
    cost = pl.CostEstimate(
        flops=2 * R * max_len * D,                     # one-hot MXU gather
        transcendentals=0,
        bytes_accessed=2 * R * D * itemsize + R * 4 + max_len * D * 4,
    )

    out2 = pl.pallas_call(
        kernel,
        out_shape=jax.ShapeDtypeStruct((R, D), hidden.dtype),
        grid_spec=pltpu.PrefetchScalarGridSpec(
            num_scalar_prefetch=0,
            grid=grid,
            in_specs=[
                pl.BlockSpec((rt, 1), lambda r: (r, 0)),         # seq positions
                pl.BlockSpec((rt, D), lambda r: (r, 0)),         # hidden rows
                pl.BlockSpec((max_len, D), lambda r: (0, 0)),    # resident PE table
            ],
            out_specs=pl.BlockSpec((rt, D), lambda r: (r, 0)),
        ),
        compiler_params=pltpu.CompilerParams(
            dimension_semantics=("parallel",),        # v7x: shard rows over both TCs
            vmem_limit_bytes=32 * 1024 * 1024,        # headroom for table + big tiles
        ),
        cost_estimate=cost,
    )(pos2, hidden2, pe)

    return out2.reshape(B, S, D)


if __name__ == "__main__":
    B, S, D = 2, 8, 32
    MAX_LEN = 64

    key = jax.random.PRNGKey(0)
    k_h, k_p = jax.random.split(key)
    hidden = jax.random.normal(k_h, (B, S, D), dtype=jnp.float32)
    seq_pos = jax.random.randint(k_p, (B, S), 0, MAX_LEN, dtype=jnp.int32)

    pe = make_pe_table(D, MAX_LEN)

    out = jax.block_until_ready(positional_encoding(hidden, seq_pos, pe))

    # Pure-JAX reference (dropout in eval mode == identity).
    ref = hidden + pe[seq_pos]                                  # [B, S, D]
    assert out.shape == (B, S, D)
    assert jnp.allclose(out, ref, atol=1e-5, rtol=1e-5), "mismatch vs reference"

    print("KERNEL_OK")
</pallas_src>

<mosaic_0001>
module attributes {stable_mosaic.version = 11 : i64} {
  func.func @_pe_add_kernel(%arg0: i32, %arg1: memref<16x1xi32, #tpu.memory_space<vmem>>, %arg2: memref<16x32xf32, #tpu.memory_space<vmem>>, %arg3: memref<64x32xf32, #tpu.memory_space<vmem>>, %arg4: memref<16x32xf32, #tpu.memory_space<vmem>>) attributes {dimension_semantics = [#tpu.dimension_semantics<parallel>], iteration_bounds = array<i64: 1>, scalar_prefetch = 0 : i64, scratch_operands = 0 : i64, tpu.core_type = #tpu.core_type<tc>, window_params = [{transform_indices = @transform_0, window_bounds = array<i64: 16, 1>}, {transform_indices = @transform_1, window_bounds = array<i64: 16, 32>}, {pipeline_mode = #tpu.pipeline_mode<synchronous>, transform_indices = @transform_2, window_bounds = array<i64: 64, 32>}, {transform_indices = @transform_3, window_bounds = array<i64: 16, 32>}]} {
    %c0 = arith.constant 0 : index
    %c0_0 = arith.constant 0 : index
    %0 = vector.load %arg1[%c0, %c0_0] : memref<16x1xi32, #tpu.memory_space<vmem>>, vector<16x1xi32>
    %c0_i32 = arith.constant 0 : i32
    %c63_i32 = arith.constant 63 : i32
    %1 = vector.broadcast %c0_i32 : i32 to vector<16x1xi32>
    %2 = arith.maxsi %1, %0 : vector<16x1xi32>
    %3 = vector.broadcast %c63_i32 : i32 to vector<16x1xi32>
    %4 = arith.minsi %3, %2 : vector<16x1xi32>
    %5 = tpu.iota {dimensions = array<i32: 1>} : vector<16x64xi32>
    %6 = vector.broadcast %4 : vector<16x1xi32> to vector<16x64xi32>
    %7 = arith.cmpi eq, %5, %6 : vector<16x64xi32>
    %8 = arith.extui %7 : vector<16x64xi1> to vector<16x64xi32>
    %9 = arith.sitofp %8 : vector<16x64xi32> to vector<16x64xf32>
    %c0_1 = arith.constant 0 : index
    %c0_2 = arith.constant 0 : index
    %10 = vector.load %arg3[%c0_1, %c0_2] : memref<64x32xf32, #tpu.memory_space<vmem>>, vector<64x32xf32>
    %cst = arith.constant dense<0.000000e+00> : vector<16x32xf32>
    %11 = tpu.matmul %9, %10, %cst {dimension_numbers = #tpu.dot_dimension_numbers<[1], [0], [0], [1], [0, 0, 1, 1], [], []>, precision = #tpu.contract_precision<fp32>} : vector<16x64xf32>, vector<64x32xf32>, vector<16x32xf32> -> vector<16x32xf32>
    %c0_3 = arith.constant 0 : index
    %c0_4 = arith.constant 0 : index
    %12 = vector.load %arg2[%c0_3, %c0_4] : memref<16x32xf32, #tpu.memory_space<vmem>>, vector<16x32xf32>
    %13 = arith.addf %12, %11 : vector<16x32xf32>
    %c0_5 = arith.constant 0 : index
    %c0_6 = arith.constant 0 : index
    %14 = vector.load %arg4[%c0_5, %c0_6] : memref<16x32xf32, #tpu.memory_space<vmem>>, vector<16x32xf32>
    tpu.vector_store %arg4[%c0_5, %c0_6], %13 {strides = array<i32>} : memref<16x32xf32, #tpu.memory_space<vmem>>, vector<16x32xf32>,
    return
  }
  func.func @transform_0(%arg0: i32) -> (i32, i32) {
    %c0_i32 = arith.constant 0 : i32
    %c0_i32_0 = arith.constant 0 : i32
    return %arg0, %c0_i32 : i32, i32
  }
  func.func @transform_1(%arg0: i32) -> (i32, i32) {
    %c0_i32 = arith.constant 0 : i32
    %c0_i32_0 = arith.constant 0 : i32
    return %arg0, %c0_i32 : i32, i32
  }
  func.func @transform_2(%arg0: i32) -> (i32, i32) {
    %c0_i32 = arith.constant 0 : i32
    %c0_i32_0 = arith.constant 0 : i32
    %c0_i32_1 = arith.constant 0 : i32
    return %c0_i32, %c0_i32_0 : i32, i32
  }
  func.func @transform_3(%arg0: i32) -> (i32, i32) {
    %c0_i32 = arith.constant 0 : i32
    %c0_i32_0 = arith.constant 0 : i32
    return %arg0, %c0_i32 : i32, i32
  }
}

</mosaic_0001>

<bundles_post_ra>
// kernel: tpu_custom_call.1
= control target key start
LH: loop header
LB: loop body
LE: loop exit
PB: predicated region body
PF: predicated region fallthrough
CT: control target
= control target key end

     0   :  { %v975_v3 = vmov 0   ;;  %s1092_s0 = inlined_call_operand.vmem [shape: s32[16,1], index: 0, kind: input, shape index: {}]   ;;  %s1093_s1 = inlined_call_operand.vmem [shape: f32[16,32], index: 1, kind: input, shape index: {}]   ;;  %s1094_s2 = inlined_call_operand.vmem [shape: f32[64,32], index: 2, kind: input, shape index: {}]   ;;  %s1095_s3 = inlined_call_operand.hbm [shape: f32[16,32], index: 3, kind: output, shape index: {}]  }
   0x1   :  { %v15_v0 = vld [vmem:[%s1092_s0] sm:$0xff]  ;;  %v16_v1 = vld [vmem:[%s1092_s0 + $0x8] sm:$0xff]  ;;  %950 = vset.pattern.permute.xlu0 %v975_v3  ;;  %v41_v6 = vld [vmem:[%s1094_s2 + $0x10] sm:$0xff] }
   0x2   :  { %v39_v2 = vld [vmem:[%s1094_s2] sm:$0xff]  ;;  %vm17_vm0 = vcmp.gt.s32.totalorder %v15_v0, 0  ;;  %vm19_vm1 = vcmp.gt.s32.totalorder %v16_v1, 0  ;;  %v40_v4 = vld [vmem:[%s1094_s2 + $0x8] sm:$0xff]  ;;  %v42_v7 = vld [vmem:[%s1094_s2 + $0x18] sm:$0xff]  ;;  %v61_v11 = vand.u32 4294901760, %v41_v6 }
   0x3   :  { %v55_v5 = vand.u32 4294901760, %v39_v2  ;;  %v18_v8 = vsel %vm17_vm0, %v15_v0, 0  ;;  %v20_v9 = vsel %vm19_vm1, %v16_v1, 0  ;;  %v58_v10 = vand.u32 4294901760, %v40_v4  ;;  %v43_v12 = vld [vmem:[%s1094_s2 + $0x20] sm:$0xff]  ;;  %v44_v13 = vld [vmem:[%s1094_s2 + $0x28] sm:$0xff] }
   0x4   :  { %vm21_vm2 = vcmp.lt.s32.totalorder %v18_v8, 63  ;;  %vm23_vm3 = vcmp.lt.s32.totalorder %v20_v9, 63  ;;  %v64_v14 = vand.u32 4294901760, %v42_v7 }
   0x5   :  { %8 = vsyncpa [#allocation3], 0  ;;  %v22_v15 = vsel %vm21_vm2, %v18_v8, 63  ;;  %v1024_v16 = vpack.c.bf16 %v58_v10, %v55_v5  ;;  %v67_v17 = vand.u32 4294901760, %v43_v12  ;;  %v70_v19 = vand.u32 4294901760, %v44_v13  ;;  %v45_v21 = vld [vmem:[%s1094_s2 + $0x30] sm:$0xff] }
   0x6   :  { %28 = vperm.xlu0 %950, %v22_v15   ;;  %v1026_v18 = vpack.c.bf16 %v64_v14, %v61_v11  ;;  %v24_v20 = vsel %vm23_vm3, %v20_v9, 63  ;;  %v46_v22 = vld [vmem:[%s1094_s2 + $0x38] sm:$0xff]  ;;  %v73_v24 = vand.u32 4294901760, %v45_v21  ;;  %v149_v26 = vsub.f32 %v39_v2, %v55_v5  ;;  %s977_s7 = smov [#allocation2]  }
   0x7   :  { %888 = vmatprep.subr.bf16.mxu0 %v1024_v16  ;;  %840 = vmatprep.subr.bf16.mxu1 %v1024_v16  ;;  %v1040_v23 = vpack.c.bf16 %v70_v19, %v67_v17  ;;  %v76_v25 = vand.u32 4294901760, %v46_v22  ;;  %v156_v27 = vsub.f32 %v40_v4, %v58_v10  ;;  %v163_v33 = vsub.f32 %v41_v6, %v61_v11  ;;  %s646_s8 = sshll.u32 %s977_s7, 4  ;;  %s647_s8 = int_to_ptr.vmem [resolvable:$true] %s646_s8 }
   0x8   :  { %890 = vmatpush3.bf16.msra.mxu0 %v1024_v16  ;;  %842 = vmatpush3.bf16.msra.mxu1 %v1024_v16  ;;  %v150_v28 = vand.u32 4294901760, %v149_v26  ;;  %v170_v34 = vsub.f32 %v42_v7, %v64_v14  ;;  %v177_v44 = vsub.f32 %v43_v12, %v67_v17  ;;  %v184_v45 = vsub.f32 %v44_v13, %v70_v19  ;;  %s951_s9 = scalar_lea.vmem %s647_s8, 256  ;;  %p956_p1 = scmp.lt.s32.totalorder %s647_s8, %s647_s8 }
   0x9   :  { %892 = vmatprep.subr.bf16.mxu0 %v1026_v18  ;;  %844 = vmatprep.subr.bf16.mxu1 %v1026_v18  ;;  %v157_v29 = vand.u32 4294901760, %v156_v27  ;;  %v1046_v30 = vpack.c.bf16 %v76_v25, %v73_v24  ;;  %v164_v38 = vand.u32 4294901760, %v163_v33  ;;  %v191_v51 = vsub.f32 %v45_v21, %v73_v24  ;;  %p952_p0 = scmp.ne.s32.totalorder %s647_s8, %s951_s9  ;;  %p957_p2 = scmp.lt.s32.totalorder %s951_s9, %s951_s9 }
   0xa   :  { %31 = vperm.xlu0 %950, %v24_v20   ;;  %v151_v31 = vsub.f32 %v149_v26, %v150_v28  ;;  %v171_v39 = vand.u32 4294901760, %v170_v34  ;;  %v178_v48 = vand.u32 4294901760, %v177_v44  ;;  %v185_v49 = vand.u32 4294901760, %v184_v45 }
   0xb   :  { %v158_v32 = vsub.f32 %v156_v27, %v157_v29  ;;  %v1050_v35 = vpack.c.bf16 %v157_v29, %v150_v28  ;;  %v165_v42 = vsub.f32 %v163_v33, %v164_v38  ;;  %v198_v52 = vsub.f32 %v46_v22, %v76_v25  ;;  %v635_v28 = vld [vmem:[%s1093_s1 + $0x8] sm:$0xff]  ;;  %p958_p3 = por %p957_p2, %p956_p1 }
   0xc   :  { %894 = vmatpush3.bf16.msra.mxu0 %v1026_v18  ;;  %846 = vmatpush3.bf16.msra.mxu1 %v1026_v18  ;;  %v152_v36 = vand.u32 4294901760, %v151_v31  ;;  %v907_v41 = vpack.c.bf16 %v171_v39, %v164_v38  ;;  %v172_v43 = vsub.f32 %v170_v34, %v171_v39  ;;  %v911_v53 = vpack.c.bf16 %v185_v49, %v178_v48  ;;  %v634_v31 = vld [vmem:[%s1093_s1] sm:$0xff] }
   0xd   :  { %896 = vmatprep.subr.bf16.mxu0 %v1040_v23  ;;  %848 = vmatprep.subr.bf16.mxu1 %v1040_v23  ;;  %v159_v37 = vand.u32 4294901760, %v158_v32  ;;  %v166_v46 = vand.u32 4294901760, %v165_v42  ;;  %v179_v54 = vsub.f32 %v177_v44, %v178_v48  ;;  %v186_v55 = vsub.f32 %v184_v45, %v185_v49  ;;  %p959_p4 = pnand %p958_p3, %p952_p0 }
   0xe   :  { %v173_v47 = vand.u32 4294901760, %v172_v43  ;;  %v192_v56 = vand.u32 4294901760, %v191_v51  ;;  %v199_v57 = vand.u32 4294901760, %v198_v52  ;;  %v871_v3 = vpack.c.bf16 %v156_v27, %v149_v26 }
   0xf   :  { %v855_v40 = vpack.c.bf16 %v159_v37, %v152_v36  ;;  %v180_v58 = vand.u32 4294901760, %v179_v54  ;;  %v187_v59 = vand.u32 4294901760, %v186_v55  ;;  %v875_v4 = vpack.c.bf16 %v170_v34, %v163_v33 }
  0x10   :  { %898 = vmatpush3.bf16.msra.mxu0 %v1040_v23  ;;  %850 = vmatpush3.bf16.msra.mxu1 %v1040_v23  ;;  %v859_v50 = vpack.c.bf16 %v173_v47, %v166_v46  ;;  %v915_v60 = vpack.c.bf16 %v199_v57, %v192_v56  ;;  %v193_v61 = vsub.f32 %v191_v51, %v192_v56  ;;  %v25_v7 = vlaneseq }
  0x11   :  { %900 = vmatprep.subr.bf16.mxu0 %v1046_v30  ;;  %852 = vmatprep.subr.bf16.mxu1 %v1046_v30  ;;  %v200_v62 = vsub.f32 %v198_v52, %v199_v57  ;;  %v863_v63 = vpack.c.bf16 %v187_v59, %v180_v58  ;;  %v879_v5 = vpack.c.bf16 %v184_v45, %v177_v44  ;;  %vm47_vm4 = vcmask 523264  }
  0x12   :  { %v194_v0 = vand.u32 4294901760, %v193_v61  ;;  %v883_v6 = vpack.c.bf16 %v198_v52, %v191_v51  ;;  %v26_v8 = vand.u32 127, %v25_v7  ;;  %v976_v10 = vmov 0.0  }
  0x13   :  { %v201_v1 = vand.u32 4294901760, %v200_v62  ;;  %vm638_vm7 = vcmask 261120  }
  0x14   :  { %902 = vmatpush3.bf16.msra.mxu0 %v1046_v30  ;;  %854 = vmatpush3.bf16.msra.mxu1 %v1046_v30 }
  0x15   :  { %904 = vmatprep.subr.bf16.mxu0 %v1050_v35  ;;  %856 = vmatprep.subr.bf16.mxu1 %v855_v40  ;;  %v867_v2 = vpack.c.bf16 %v201_v1, %v194_v0 }
  0x85   :  { %v29_v9 = vpop.permute.xlu0 %28 }
  0x86   :  { %vm33_vm5 = vcmp.eq.s32.totalorder %v26_v8, %v29_v9 }
  0x87   :  { %v657_v11 = vsel %vm33_vm5, 1.0, %v976_v10 }
  0x88   :  { %v49_v12 = vsel %vm47_vm4, %v657_v11, 0 }
  0x89   :  { %v128_v13 = vsub.f32 %v49_v12, %v49_v12  ;;  %v32_v14 = vpop.permute.xlu0 %31 }
  0x8a   :  { %vm34_vm6 = vcmp.eq.s32.totalorder %v26_v8, %v32_v14 }
  0x8b   :  { %v658_v15 = vsel %vm34_vm6, 1.0, %v976_v10  ;;  %v129_v17 = vand.u32 4294901760, %v128_v13 }
  0x8c   :  { %v52_v19 = vsel %vm47_vm4, %v658_v15, 0 }
  0x8d   :  { %v138_v20 = vsub.f32 %v52_v19, %v52_v19  ;;  %798 = vmatprep.mubr.f32.mxu0 %v129_v17  ;;  %v130_v21 = vsub.f32 %v128_v13, %v129_v17 }
  0x8f   :  { %v131_v22 = vand.u32 4294901760, %v130_v21  ;;  %v139_v24 = vand.u32 4294901760, %v138_v20 }
  0x91   :  { %741 = vmatprep.mubr.f32.mxu1 %v131_v22  ;;  %799 = vmatmul.mubr.f32.vlgmr.msra.gmra.mrb[0].mxu0 %v139_v24  ;;  %v140_v25 = vsub.f32 %v138_v20, %v139_v24 }
  0x92   :  { %906 = vmatpush3.bf16.msra.mxu0 %v1050_v35  ;;  %817 = vmatprep.mubr.msk.f32.mxu0 %vm47_vm4, %v657_v11 }
  0x93   :  { %908 = vmatprep.subr.bf16.mxu0 %v907_v41  ;;  %v141_v26 = vand.u32 4294901760, %v140_v25 }
  0x95   :  { %742 = vmatmul.mubr.f32.vlgmr.msra.gmra.mrb[0].mxu1 %v141_v26 }
  0x96   :  { %858 = vmatpush3.bf16.msra.mxu1 %v855_v40  ;;  %910 = vmatpush3.bf16.msra.mxu0 %v907_v41 }
  0x97   :  { %760 = vmatprep.mubr.msk.f32.mxu1 %vm47_vm4, %v657_v11  ;;  %860 = vmatprep.subr.bf16.mxu1 %v859_v50 }
  0x98   :  { %912 = vmatprep.subr.bf16.mxu0 %v911_v53 }
  0x9a   :  { %862 = vmatpush3.bf16.msra.mxu1 %v859_v50  ;;  %914 = vmatpush3.bf16.msra.mxu0 %v911_v53 }
  0x9b   :  { %864 = vmatprep.subr.bf16.mxu1 %v863_v63  ;;  %916 = vmatprep.subr.bf16.mxu0 %v915_v60 }
  0x9e   :  { %866 = vmatpush3.bf16.msra.mxu1 %v863_v63  ;;  %918 = vmatpush3.bf16.msra.mxu0 %v915_v60 }
  0x9f   :  { %868 = vmatprep.subr.bf16.mxu1 %v867_v2  ;;  %920 = vmatprep.subr.bf16.mxu0 %v1024_v16 }
  0xa1   :  { %818 = vmatmul.mubr.msk.f32.vlgmr.msra.gmra.mrb[0].mxu0 %vm47_vm4, %v658_v15 }
  0xa2   :  { %870 = vmatpush3.bf16.msra.mxu1 %v867_v2  ;;  %922 = vmatpush3.bf16.msra.mxu0 %v1024_v16 }
  0xa3   :  { %836 = vmatprep.mubr.msk.f32.mxu0 %vm47_vm4, %v657_v11  ;;  %872 = vmatprep.subr.bf16.mxu1 %v871_v3 }
  0xa4   :  { %924 = vmatprep.subr.bf16.mxu0 %v1026_v18 }
  0xa5   :  { %761 = vmatmul.mubr.msk.f32.vlgmr.msra.gmra.mrb[0].mxu1 %vm47_vm4, %v658_v15 }
  0xa6   :  { %874 = vmatpush3.bf16.msra.mxu1 %v871_v3  ;;  %779 = vmatprep.mubr.f32.mxu1 %v128_v13 }
  0xa7   :  { %926 = vmatpush3.bf16.msra.mxu0 %v1026_v18  ;;  %876 = vmatprep.subr.bf16.mxu1 %v875_v4 }
  0xa8   :  { %928 = vmatprep.subr.bf16.mxu0 %v1040_v23 }
  0xaa   :  { %878 = vmatpush3.bf16.msra.mxu1 %v875_v4 }
  0xab   :  { %930 = vmatpush3.bf16.msra.mxu0 %v1040_v23  ;;  %880 = vmatprep.subr.bf16.mxu1 %v879_v5 }
  0xac   :  { %932 = vmatprep.subr.bf16.mxu0 %v1046_v30 }
  0xae   :  { %882 = vmatpush3.bf16.msra.mxu1 %v879_v5 }
  0xaf   :  { %934 = vmatpush3.bf16.msra.mxu0 %v1046_v30  ;;  %884 = vmatprep.subr.bf16.mxu1 %v883_v6 }
  0xb2   :  { %837 = vmatmul.mubr.msk.f32.vlgmr.msra.gmra.mrb[0].mxu0 %vm47_vm4, %v658_v15  ;;  %886 = vmatpush3.bf16.msra.mxu1 %v883_v6 }
  0xb5   :  { %780 = vmatmul.mubr.f32.vlgmr.msra.gmra.mrb[0].mxu1 %v138_v20 }
 0x185   :  { %v838_v16 = vpop.f32.mrb[0].mxu0 }
 0x186   :  { %v624_v27 = vpop.f32.mrb[1].mxu0 }
 0x188   :  { %v781_v18 = vpop.f32.mrb[0].mxu1 }
 0x189   :  { %v935_v29 = vadd.f32 %v838_v16, %v781_v18  ;;  %v348_v23 = vpop.f32.mrb[1].mxu1 }
 0x18a   :  { %v936_v30 = vadd.f32 %v624_v27, %v348_v23 }
 0x18b   :  { %v637_v32 = vadd.f32 %v935_v29, %v635_v28 }
 0x18c   :  { %v636_v33 = vadd.f32 %v936_v30, %v634_v31 }
 0x18d   :  { %640 = vst.msk [vmem:[#allocation2 + $0x8] sm:$0xff] %vm638_vm7, %v637_v32 }
 0x18e   :  { %639 = vst.msk [vmem:[#allocation2] sm:$0xff] %vm638_vm7, %v636_v33 }
 0x18f   :  { %962 = shalt.err (!%p959_p4)
}
 0x190   :  { %s963_s1 = scalar_lea.hbm %s1095_s3, 256 }
 0x191   :  { %p964_p5 = scmp.ne.s32.totalorder %s1095_s3, %s963_s1  ;;  %p967_p6 = scmp.lt.u32.totalorder %s963_s1, %s1095_s3 }
 0x193   :  { %p969_p7 = pnand %p967_p6, %p964_p5 }
 0x195   :  { %972 = shalt.err (!%p969_p7)
}
 0x196   :  { %s978_s16 = smov 128   ;;  %s979_s17 = smov 8  }
 0x197   :  { %652 = dma.vmem_to_hbm [thread:$0]  %s647_s8, 256, %s1095_s3, [#allocation3], %s978_s16, %s978_s16, %s979_s17  }
 0x198   :  { %973 = dma.done.wait [#allocation3], 256  }
 0x199   :  { %974 = vsyncadd [#allocation3], 4294967040 }
 0x19a   :  { %656 = vsyncpa [#allocation3], 1 }

</bundles_post_ra>
